<compile_context>
chip_gen: v6e
topology: v6e:2x2x1
jax: 0.10.0
libtpu: 0.0.40
codegen_flags: <defaults>
</compile_context>

<pallas_src>
import math
import functools

import jax
import jax.numpy as jnp
from jax import lax
from jax.experimental import pallas as pl
from jax.experimental.pallas import tpu as pltpu


def _round_up(x, m):
    return ((x + m - 1) // m) * m


def _choose_block_tokens(n_tokens, *, max_tokens=4096, min_steps=4, min_block=512):
    """Tokens per grid step.

    Prefers (a) a tile that divides the 8-aligned token count (no tail padding
    -> no wrapper-side slice copy), (b) tiles large enough to amortize the
    per-step overhead, and (c) >= min_steps grid steps on medium/large inputs
    so v7x's two TensorCores both get blocks.
    """
    n8 = _round_up(n_tokens, 8)
    if n8 <= max_tokens:
        # Split into min_steps blocks only when each block stays big enough to
        # amortize the ~0.35us per-step overhead (v7x 2-TC split for free).
        if n8 % (8 * min_steps) == 0 and n8 // min_steps >= min_block:
            return n8 // min_steps
        return n8
    # Large inputs: biggest multiple-of-8 tile <= max_tokens that divides n8
    # (search the top half), else fall back to max_tokens (needs padding).
    t = max(8, (max_tokens // 8) * 8)
    for cand in range(t, t // 2, -8):
        if n8 % cand == 0:
            return cand
    return t


def persona_emb_kernel(ids_ref, tbl_ref, out_ref, *, scale, precision):
    # ids_ref: (1, 1, T) int32 token ids, lane-dense.
    # tbl_ref: (V, D) embedding table, VMEM-resident (constant block index).
    # out_ref: (T, D) scaled embeddings.
    V = tbl_ref.shape[0]
    T = out_ref.shape[0]

    ids_row = ids_ref[0]                                      # (1, T) int32
    vocab_iota = lax.broadcasted_iota(jnp.int32, (V, T), 0)   # (V, T)
    # Exact 0/1 one-hot; the sqrt(D) scale is applied after the matmul on the
    # VPU so the MXU only sees exact values (precision relaxable if desired).
    one_hot_t = jnp.where(vocab_iota == ids_row, 1.0, 0.0).astype(tbl_ref.dtype)

    # (V, T)^T contracted with (V, D) -> (T, D): transposed-LHS MXU matmul,
    # avoids any in-kernel relayout of the lane-dense ids.
    gathered = lax.dot_general(
        one_hot_t,
        tbl_ref[...],
        dimension_numbers=(((0,), (0,)), ((), ())),
        preferred_element_type=jnp.float32,
        precision=precision,
    )
    out_ref[...] = (gathered * scale).astype(out_ref.dtype)


def persona_emb(persona, emb_table, *, max_block_tokens=4096, out_dtype=None,
                precision=lax.Precision.HIGHEST):
    """persona: (B, S) int ids; emb_table: (V, D) -> (B, S, D).

    out_dtype: set to jnp.bfloat16 if downstream accepts it -- halves the
    dominant HBM write traffic; defaults to the table dtype (exact semantics).
    """
    B, S = persona.shape
    V, D = emb_table.shape
    scale = math.sqrt(D)
    out_dtype = emb_table.dtype if out_dtype is None else out_dtype

    n = B * S
    T = _choose_block_tokens(n, max_tokens=max_block_tokens)
    n_pad = _round_up(n, T)
    n_blocks = n_pad // T

    flat_ids = persona.reshape(-1).astype(jnp.int32)
    if n_pad != n:
        # Pad tail with id 0 (pad row); padded rows are sliced off below.
        # _choose_block_tokens avoids this path whenever a clean divisor exists.
        flat_ids = jnp.pad(flat_ids, (0, n_pad - n))
    ids_blocks = flat_ids.reshape(n_blocks, 1, T)   # lane-dense id layout

    # VMEM budget: resident table (single-buffered) + double-buffered (T, D)
    # out blocks + double-buffered (1, 8, T) sublane-padded id blocks.
    out_itemsize = jnp.dtype(out_dtype).itemsize
    vmem_est = (V * D * jnp.dtype(emb_table.dtype).itemsize
                + 2 * T * D * out_itemsize
                + 2 * 8 * T * 4)
    default_scoped = 32 * 1024 * 1024
    vmem_limit = None
    if vmem_est > (3 * default_scoped) // 4:
        vmem_limit = min(int(1.5 * vmem_est), 100 * 1024 * 1024)

    out_flat = pl.pallas_call(
        functools.partial(persona_emb_kernel, scale=scale, precision=precision),
        out_shape=jax.ShapeDtypeStruct((n_pad, D), out_dtype),
        grid=(n_blocks,),
        in_specs=[
            # ids for this block (lane-dense, tiny VMEM footprint)
            pl.BlockSpec((1, 1, T), lambda i: (i, 0, 0)),
            # whole table: constant block index -> DMA'd once, kept resident;
            # single buffer since it never changes.
            pl.BlockSpec((V, D), lambda i: (0, 0), pipeline_mode=pl.Buffered(1)),
        ],
        out_specs=pl.BlockSpec((T, D), lambda i: (i, 0)),
        compiler_params=pltpu.CompilerParams(
            dimension_semantics=("parallel",),
            vmem_limit_bytes=vmem_limit,
        ),
    )(ids_blocks, emb_table)

    if n_pad != n:
        out_flat = out_flat[:n]
    return out_flat.reshape(B, S, D)


def make_embedding_table(key, vocab, emb_dim, pad_idx):
    """Deterministic synthetic embedding weights (nn.Embedding-style),
    with the pad_idx row zeroed (padding_idx semantics)."""
    tbl = jax.random.normal(key, (vocab, emb_dim), dtype=jnp.float32)
    tbl = tbl.at[pad_idx].set(0.0)
    return tbl


if __name__ == "__main__":
    B, S = 2, 8          # batch, persona sequence length
    VOCAB, EMB_DIM = 32, 128
    PAD_IDX = 0

    key = jax.random.PRNGKey(0)
    k_tbl, k_ids = jax.random.split(key)

    emb_table = make_embedding_table(k_tbl, VOCAB, EMB_DIM, PAD_IDX)
    persona = jax.random.randint(k_ids, (B, S), 0, VOCAB, dtype=jnp.int32)
    # force a couple of pad tokens to exercise the zeroed pad row
    persona = persona.at[0, 0].set(PAD_IDX).at[1, -1].set(PAD_IDX)

    out = persona_emb(persona, emb_table)
    out = jax.block_until_ready(out)

    # reference check (plain JAX gather)
    ref = jnp.take(emb_table, persona, axis=0) * math.sqrt(EMB_DIM)
    assert out.shape == (B, S, EMB_DIM)
    assert jnp.allclose(out, ref, atol=1e-3, rtol=1e-3), float(
        jnp.max(jnp.abs(out - ref)))

    print("KERNEL_OK")
</pallas_src>

<mosaic_0001>
module attributes {stable_mosaic.version = 11 : i64} {
  func.func @persona_emb_kernel(%arg0: i32, %arg1: memref<1x1x16xi32, #tpu.memory_space<vmem>>, %arg2: memref<32x128xf32, #tpu.memory_space<vmem>>, %arg3: memref<16x128xf32, #tpu.memory_space<vmem>>) attributes {dimension_semantics = [#tpu.dimension_semantics<parallel>], iteration_bounds = array<i64: 1>, scalar_prefetch = 0 : i64, scratch_operands = 0 : i64, tpu.core_type = #tpu.core_type<tc>, window_params = [{transform_indices = @transform_0, window_bounds = array<i64: 1, 1, 16>}, {pipeline_mode = #tpu.pipeline_mode<synchronous>, transform_indices = @transform_1, window_bounds = array<i64: 32, 128>}, {transform_indices = @transform_2, window_bounds = array<i64: 16, 128>}]} {
    %c0 = arith.constant 0 : index
    %c0_0 = arith.constant 0 : index
    %c0_1 = arith.constant 0 : index
    %0 = vector.load %arg1[%c0, %c0_0, %c0_1] : memref<1x1x16xi32, #tpu.memory_space<vmem>>, vector<1x1x16xi32>
    %1 = vector.shape_cast %0 : vector<1x1x16xi32> to vector<1x16xi32>
    %2 = tpu.iota {dimensions = array<i32: 0>} : vector<32x16xi32>
    %3 = vector.broadcast %1 : vector<1x16xi32> to vector<32x16xi32>
    %4 = arith.cmpi eq, %2, %3 : vector<32x16xi32>
    %cst = arith.constant 1.000000e+00 : f32
    %cst_2 = arith.constant 0.000000e+00 : f32
    %5 = vector.broadcast %cst : f32 to vector<32x16xf32>
    %6 = vector.broadcast %cst_2 : f32 to vector<32x16xf32>
    %7 = arith.select %4, %5, %6 : vector<32x16xi1>, vector<32x16xf32>
    %c0_3 = arith.constant 0 : index
    %c0_4 = arith.constant 0 : index
    %8 = vector.load %arg2[%c0_3, %c0_4] : memref<32x128xf32, #tpu.memory_space<vmem>>, vector<32x128xf32>
    %cst_5 = arith.constant dense<0.000000e+00> : vector<16x128xf32>
    %9 = tpu.matmul %7, %8, %cst_5 {dimension_numbers = #tpu.dot_dimension_numbers<[0], [0], [1], [1], [0, 1, 1, 1], [], []>, precision = #tpu.contract_precision<fp32>} : vector<32x16xf32>, vector<32x128xf32>, vector<16x128xf32> -> vector<16x128xf32>
    %cst_6 = arith.constant 11.3137083 : f32
    %10 = vector.broadcast %cst_6 : f32 to vector<16x128xf32>
    %11 = arith.mulf %9, %10 : vector<16x128xf32>
    %c0_7 = arith.constant 0 : index
    %c0_8 = arith.constant 0 : index
    %12 = vector.load %arg3[%c0_7, %c0_8] : memref<16x128xf32, #tpu.memory_space<vmem>>, vector<16x128xf32>
    tpu.vector_store %arg3[%c0_7, %c0_8], %11 {strides = array<i32>} : memref<16x128xf32, #tpu.memory_space<vmem>>, vector<16x128xf32>,
    return
  }
  func.func @transform_0(%arg0: i32) -> (i32, i32, i32) {
    %c0_i32 = arith.constant 0 : i32
    %c0_i32_0 = arith.constant 0 : i32
    %c0_i32_1 = arith.constant 0 : i32
    return %arg0, %c0_i32, %c0_i32_0 : i32, i32, i32
  }
  func.func @transform_1(%arg0: i32) -> (i32, i32) {
    %c0_i32 = arith.constant 0 : i32
    %c0_i32_0 = arith.constant 0 : i32
    %c0_i32_1 = arith.constant 0 : i32
    return %c0_i32, %c0_i32_0 : i32, i32
  }
  func.func @transform_2(%arg0: i32) -> (i32, i32) {
    %c0_i32 = arith.constant 0 : i32
    %c0_i32_0 = arith.constant 0 : i32
    return %arg0, %c0_i32 : i32, i32
  }
}

</mosaic_0001>

<bundles_post_ra>
// kernel: tpu_custom_call.1
= control target key start
LH: loop header
LB: loop body
LE: loop exit
PB: predicated region body
PF: predicated region fallthrough
CT: control target
= control target key end

     0   :  { %7 = vsyncpa [#allocation3], 0  ;;  %s940_s0 = inlined_call_operand.hbm [shape: s32[1,1,16], index: 0, kind: input, shape index: {}]   ;;  %s941_s1 = inlined_call_operand.hbm [shape: f32[32,128], index: 1, kind: input, shape index: {}]   ;;  %s942_s2 = inlined_call_operand.hbm [shape: f32[16,128], index: 2, kind: output, shape index: {}]  }
   0x1   :  { %8 = vsyncpa [#allocation6], 0 }
   0x2   :  { %9 = vsyncpa [#allocation4], 0  ;;  %s824_s9 = smov [#allocation2]   ;;  %s825_s11 = smov [#allocation5]  }
   0x3   :  { %s16_s10 = sshll.u32 %s824_s9, 4  ;;  %s25_s12 = sshll.u32 %s825_s11, 4  ;;  %s17_s10 = int_to_ptr.vmem [resolvable:$true] %s16_s10  ;;  %s26_s12 = int_to_ptr.vmem [resolvable:$true] %s25_s12 }
   0x4   :  { %s766_s13 = scalar_lea.vmem %s17_s10, 16  ;;  %s770_s14 = scalar_lea.vmem %s17_s10, 32 }
   0x5   :  { %p767_p0 = scmp.ne.s32.totalorder %s17_s10, %s766_s13  ;;  %p771_p1 = scmp.lt.s32.totalorder %s17_s10, %s17_s10 }
   0x6   :  { %p772_p2 = scmp.lt.s32.totalorder %s770_s14, %s766_s13 }
   0x8   :  { %p773_p3 = por %p772_p2, %p771_p1 }
   0xa   :  { %p774_p4 = pnand %p773_p3, %p767_p0 }
   0xc   :  { %777 = shalt.err (!%p774_p4)
}
   0xd   :  { %19 = dma.hbm_to_vmem [thread:$0]  %s940_s0, 16, %s17_s10, [#allocation3]  }
   0xe   :  { %s786_s17 = scalar_lea.vmem %s26_s12, 512  ;;  %p791_p6 = scmp.lt.s32.totalorder %s26_s12, %s26_s12 }
   0xf   :  { %p787_p5 = scmp.ne.s32.totalorder %s26_s12, %s786_s17  ;;  %p792_p7 = scmp.lt.s32.totalorder %s786_s17, %s786_s17 }
  0x11   :  { %p793_p8 = por %p792_p7, %p791_p6 }
  0x13   :  { %p794_p9 = pnand %p793_p8, %p787_p5 }
  0x15   :  { %797 = shalt.err (!%p794_p9)
}
  0x16   :  { %s826_s18 = smov 128   ;;  %s827_s19 = smov 8  }
  0x17   :  { %31 = dma.hbm_to_vmem [thread:$0]  %s941_s1, 512, %s26_s12, [#allocation6], %s826_s18, %s826_s18, %s827_s19  }
  0x18   :  { %818 = dma.done.wait [#allocation3], 16  }
  0x19   :  { %819 = vsyncadd [#allocation3], 4294967280 }
  0x1a   :  { %820 = dma.done.wait [#allocation6], 512  }
  0x1b   :  { %821 = vsyncadd [#allocation6], 4294966784  ;;  %v39_v0 = vlaneseq  ;;  %v649_v3 = vld [vmem:[#allocation2] ss:$0 sm:$0xff]  ;;  %v58_v6 = vld [vmem:[#allocation5 + $0x10] sm:$0xff]  ;;  %v828_v9 = vmov 0.0  }
  0x1c   :  { %v59_v5 = vld [vmem:[#allocation5 + $0x18] sm:$0xff]  ;;  %v57_v7 = vld [vmem:[#allocation5 + $0x8] sm:$0xff]  ;;  %v56_v8 = vld [vmem:[#allocation5] sm:$0xff]  ;;  %v856_v12 = vand.u32 4294901760, %v58_v6  ;;  %vm92_vm4 = vcmask 261120   ;;  %s829_s0 = smov [#allocation7]  }
  0x1d   :  { %v40_v1 = vshrl.u32 %v39_v0, 7  ;;  %v854_v11 = vand.u32 4294901760, %v59_v5  ;;  %v858_v13 = vand.u32 4294901760, %v57_v7  ;;  %v860_v14 = vand.u32 4294901760, %v56_v8  ;;  %s636_s1 = sshll.u32 %s829_s0, 4  ;;  %s637_s1 = int_to_ptr.vmem [resolvable:$true] %s636_s1 }
  0x1e   :  { %v866_v18 = vsub.f32 %v58_v6, %v856_v12  ;;  %s798_s22 = scalar_lea.vmem %s637_s1, 256  ;;  %p803_p11 = scmp.lt.s32.totalorder %s637_s1, %s637_s1 }
  0x1f   :  { %v41_v2 = vadd.s32 8, %v40_v1  ;;  %v42_v4 = vadd.s32 16, %v40_v1  ;;  %vm48_vm0 = vcmp.eq.s32.totalorder %v40_v1, %v649_v3  ;;  %v43_v16 = vadd.s32 24, %v40_v1  ;;  %686 = vmatprep.subr.mxu0 %v854_v11  ;;  %p799_p10 = scmp.ne.s32.totalorder %s637_s1, %s798_s22  ;;  %p804_p12 = scmp.lt.s32.totalorder %s798_s22, %s798_s22 }
  0x20   :  { %v52_v10 = vsel %vm48_vm0, 1.0, %v828_v9  ;;  %v863_v17 = vsub.f32 %v59_v5, %v854_v11  ;;  %v869_v19 = vsub.f32 %v57_v7, %v858_v13  ;;  %v872_v20 = vsub.f32 %v56_v8, %v860_v14  ;;  %687 = vmatpush3.msra.mxu0 %v854_v11 }
  0x21   :  { %vm49_vm1 = vcmp.eq.s32.totalorder %v41_v2, %v649_v3  ;;  %60 = vxpose.xlu0.b32.start [1/4] (short) (narrow) %v52_v10, 16  ;;  %vm50_vm2 = vcmp.eq.s32.totalorder %v42_v4, %v649_v3  ;;  %v880_v22 = vand.u32 4294901760, %v866_v18  ;;  %688 = vmatprep.subr.mxu0 %v856_v12  ;;  %vm51_vm3 = vcmp.eq.s32.totalorder %v43_v16, %v649_v3  ;;  %p805_p13 = por %p804_p12, %p803_p11 }
  0x22   :  { %v53_v15 = vsel %vm49_vm1, 1.0, %v828_v9  ;;  %v877_v21 = vand.u32 4294901760, %v863_v17  ;;  %v883_v23 = vand.u32 4294901760, %v869_v19  ;;  %v886_v24 = vand.u32 4294901760, %v872_v20  ;;  %689 = vmatpush3.msra.mxu0 %v856_v12 }
  0x23   :  { %v54_v25 = vsel %vm50_vm2, 1.0, %v828_v9  ;;  %v223_v27 = vsub.f32 %v866_v18, %v880_v22  ;;  %690 = vmatprep.subr.mxu0 %v858_v13  ;;  %v55_v32 = vsel %vm51_vm3, 1.0, %v828_v9  ;;  %p806_p0 = pnand %p805_p13, %p799_p10 }
  0x24   :  { %v216_v26 = vsub.f32 %v863_v17, %v877_v21  ;;  %v230_v28 = vsub.f32 %v869_v19, %v883_v23  ;;  %691 = vmatpush3.msra.mxu0 %v858_v13  ;;  %v237_v31 = vsub.f32 %v872_v20, %v886_v24 }
  0x25   :  { %61 = vxpose.xlu0.b32.cont [2/4] (short) (narrow) %v53_v15, 16  ;;  %v224_v30 = vand.u32 4294901760, %v223_v27  ;;  %692 = vmatprep.subr.mxu0 %v860_v14 }
  0x26   :  { %v217_v29 = vand.u32 4294901760, %v216_v26  ;;  %693 = vmatpush3.msra.mxu0 %v860_v14  ;;  %v231_v33 = vand.u32 4294901760, %v230_v28  ;;  %v238_v34 = vand.u32 4294901760, %v237_v31 }
  0x27   :  { %708 = vmatprep.subr.mxu0 %v863_v17 }
  0x28   :  { %697 = vmatprep.subr.mxu1 %v217_v29 }
  0x29   :  { %62 = vxpose.xlu0.b32.cont [3/4] (short) (narrow) %v54_v25, 16  ;;  %698 = vmatpush3.msra.mxu1 %v217_v29 }
  0x2a   :  { %699 = vmatprep.subr.mxu1 %v224_v30 }
  0x2b   :  { %700 = vmatpush3.msra.mxu1 %v224_v30 }
  0x2c   :  { %701 = vmatprep.subr.mxu1 %v231_v33 }
  0x2d   :  { %63 = vxpose.xlu0.b32.end [4/4] (short) (narrow) %v55_v32, 16  ;;  %702 = vmatpush3.msra.mxu1 %v231_v33 }
  0x2e   :  { %703 = vmatprep.subr.mxu1 %v238_v34 }
  0x2f   :  { %704 = vmatpush3.msra.mxu1 %v238_v34 }
  0x30   :  { %719 = vmatprep.subr.mxu1 %v854_v11 }
  0x9d   :  { %v76_v35 = vpop.trf.xlu0 }
  0x9e   :  { %v94_v36 = vsel %vm92_vm4, %v76_v35, 0 }
  0x9f   :  { %v168_v37 = vand.u32 4294901760, %v94_v36 }
  0xa1   :  { %v169_v38 = vsub.f32 %v94_v36, %v168_v37  ;;  %705 = vmatprep.mubr.f32.mxu1 %v168_v37  ;;  %v77_v39 = vpop.trf.xlu0 }
  0xa2   :  { %v97_v40 = vsel %vm92_vm4, %v77_v39, 0 }
  0xa3   :  { %v178_v41 = vand.u32 4294901760, %v97_v40  ;;  %v170_v42 = vand.u32 4294901760, %v169_v38 }
  0xa5   :  { %v179_v43 = vsub.f32 %v97_v40, %v178_v41  ;;  %706 = vmatmul.mubr.f32.vlgmr.msra.gmra.mxu1 %v178_v41  ;;  %v171_v44 = vsub.f32 %v169_v38, %v170_v42 }
  0xa6   :  { %720 = vmatpush3.msra.mxu1 %v854_v11  ;;  %727 = vmatprep.mubr.f32.mxu1 %v170_v42 }
  0xa7   :  { %v180_v45 = vand.u32 4294901760, %v179_v43  ;;  %721 = vmatprep.subr.mxu1 %v856_v12  ;;  %v172_v46 = vand.u32 4294901760, %v171_v44 }
  0xa8   :  { %722 = vmatpush3.msra.mxu1 %v856_v12 }
  0xa9   :  { %723 = vmatprep.subr.mxu1 %v858_v13  ;;  %694 = vmatprep.mubr.f32.mxu0 %v172_v46  ;;  %v181_v47 = vsub.f32 %v179_v43, %v180_v45 }
  0xaa   :  { %724 = vmatpush3.msra.mxu1 %v858_v13 }
  0xab   :  { %725 = vmatprep.subr.mxu1 %v860_v14  ;;  %v182_v48 = vand.u32 4294901760, %v181_v47 }
  0xac   :  { %726 = vmatpush3.msra.mxu1 %v860_v14 }
  0xad   :  { %728 = vmatmul.mubr.f32.vlgmr.msra.gmra.mxu1 %v180_v45  ;;  %741 = vmatprep.subr.mxu1 %v854_v11 }
  0xae   :  { %695 = vmatmul.mubr.f32.vlgmr.msra.gmra.mxu0 %v182_v48  ;;  %742 = vmatpush3.msra.mxu1 %v854_v11 }
  0xaf   :  { %709 = vmatpush3.msra.mxu0 %v863_v17  ;;  %749 = vmatprep.mubr.f32.mxu1 %v168_v37 }
  0xb0   :  { %710 = vmatprep.subr.mxu0 %v866_v18  ;;  %716 = vmatprep.mubr.f32.mxu0 %v169_v38 }
  0xb1   :  { %743 = vmatprep.subr.mxu1 %v856_v12  ;;  %711 = vmatpush3.msra.mxu0 %v866_v18 }
  0xb2   :  { %744 = vmatpush3.msra.mxu1 %v856_v12  ;;  %712 = vmatprep.subr.mxu0 %v869_v19 }
  0xb3   :  { %745 = vmatprep.subr.mxu1 %v858_v13  ;;  %713 = vmatpush3.msra.mxu0 %v869_v19 }
  0xb4   :  { %746 = vmatpush3.msra.mxu1 %v858_v13  ;;  %714 = vmatprep.subr.mxu0 %v872_v20 }
  0xb5   :  { %747 = vmatprep.subr.mxu1 %v860_v14  ;;  %715 = vmatpush3.msra.mxu0 %v872_v20 }
  0xb6   :  { %748 = vmatpush3.msra.mxu1 %v860_v14  ;;  %717 = vmatmul.mubr.f32.vlgmr.msra.gmra.mxu0 %v179_v43 }
  0xb7   :  { %730 = vmatprep.subr.mxu0 %v877_v21  ;;  %750 = vmatmul.mubr.f32.vlgmr.msra.gmra.mxu1 %v178_v41 }
  0xb8   :  { %731 = vmatpush3.msra.mxu0 %v877_v21  ;;  %738 = vmatprep.mubr.f32.mxu0 %v168_v37 }
  0xb9   :  { %732 = vmatprep.subr.mxu0 %v880_v22 }
  0xba   :  { %733 = vmatpush3.msra.mxu0 %v880_v22 }
  0xbb   :  { %734 = vmatprep.subr.mxu0 %v883_v23 }
  0xbc   :  { %735 = vmatpush3.msra.mxu0 %v883_v23 }
  0xbd   :  { %736 = vmatprep.subr.mxu0 %v886_v24 }
  0xbe   :  { %737 = vmatpush3.msra.mxu0 %v886_v24 }
  0xbf   :  { %739 = vmatmul.mubr.f32.vlgmr.msra.gmra.mxu0 %v178_v41 }
 0x165   :  { %v707_v50 = vpop.f32.mrf.mxu1 }
 0x167   :  { %v275_v53 = vpop.f32.mrf.mxu1 }
 0x16d   :  { %v729_v55 = vpop.f32.mrf.mxu1 }
 0x16e   :  { %v696_v49 = vpop.f32.mrf.mxu0 }
 0x16f   :  { %v282_v54 = vadd.f32 %v707_v50, %v696_v49  ;;  %v445_v60 = vpop.f32.mrf.mxu1 }
 0x170   :  { %v174_v51 = vpop.f32.mrf.mxu0 }
 0x171   :  { %v276_v57 = vadd.f32 %v275_v53, %v174_v51 }
 0x176   :  { %v718_v52 = vpop.f32.mrf.mxu0 }
 0x177   :  { %v369_v58 = vadd.f32 %v718_v52, %v282_v54  ;;  %v751_v62 = vpop.f32.mrf.mxu1 }
 0x178   :  { %v361_v56 = vpop.f32.mrf.mxu0 }
 0x179   :  { %v362_v59 = vadd.f32 %v361_v56, %v276_v57  ;;  %v454_v61 = vadd.f32 %v729_v55, %v369_v58  ;;  %v617_v5 = vpop.f32.mrf.mxu1 }
 0x17b   :  { %v446_v1 = vadd.f32 %v445_v60, %v362_v59 }
 0x17f   :  { %v740_v63 = vpop.f32.mrf.mxu0 }
 0x180   :  { %v543_v0 = vadd.f32 %v740_v63, %v454_v61 }
 0x181   :  { %v536_v2 = vpop.f32.mrf.mxu0 }
 0x182   :  { %v624_v3 = vadd.f32 %v751_v62, %v543_v0  ;;  %v537_v4 = vadd.f32 %v536_v2, %v446_v1 }
 0x184   :  { %v628_v6 = vmul.f32 11.313708, %v624_v3  ;;  %v618_v7 = vadd.f32 %v617_v5, %v537_v4 }
 0x186   :  { %630 = vst [vmem:[#allocation7 + $0x8] sm:$0xff] %v628_v6  ;;  %v627_v8 = vmul.f32 11.313708, %v618_v7 }
 0x188   :  { %629 = vst [vmem:[#allocation7] sm:$0xff] %v627_v8 }
 0x189   :  { %809 = shalt.err (!%p806_p0)
}
 0x18a   :  { %642 = dma.vmem_to_hbm [thread:$0]  %s637_s1, 256, %s942_s2, [#allocation4], %s826_s18, %s826_s18, %s827_s19  }
 0x18b   :  { %822 = dma.done.wait [#allocation4], 256  }
 0x18c   :  { %823 = vsyncadd [#allocation4], 4294967040 }
 0x18d   :  { %646 = vsyncpa [#allocation3], 1 }
 0x18e   :  { %647 = vsyncpa [#allocation6], 1 }
 0x18f   :  { %648 = vsyncpa [#allocation4], 1 }

</bundles_post_ra>
